<compile_context>
chip_gen: v7x
topology: tpu7x:2x2x1
jax: 0.10.0
libtpu: 0.0.40
codegen_flags: <defaults>
</compile_context>

<pallas_src>
import jax
import jax.numpy as jnp
from jax import lax
from jax.experimental import pallas as pl
from jax.experimental.pallas import tpu as pltpu

HIDDEN = 256


def _critic_kernel(xs_ref, xa_ref, w1s_ref, w1a_ref, b1_ref,
                   w2_ref, b2_ref, w3_ref, b3_ref, o_ref):
    cdt = w1s_ref.dtype   # MXU compute dtype (bf16 fast path, or f32)
    edt = b1_ref.dtype    # epilogue dtype (f32 default; bf16 opt-in on v6e/v7x)

    # In-kernel cast of the activation tiles (no wrapper-side HBM pass).
    xs = xs_ref[...].astype(cdt)
    xa = xa_ref[...].astype(cdt)

    # Layer 1 (fused concat): h1 = relu(states @ W1_s + actions @ W1_a + b1)
    acc1 = jnp.dot(xs, w1s_ref[...], preferred_element_type=jnp.float32)
    acc1 = acc1 + jnp.dot(xa, w1a_ref[...], preferred_element_type=jnp.float32)
    h1 = jnp.maximum(acc1.astype(edt) + b1_ref[...], 0).astype(cdt)

    # Layer 2: h2 = relu(h1 @ W2 + b2)
    acc2 = jnp.dot(h1, w2_ref[...], preferred_element_type=jnp.float32)
    h2 = jnp.maximum(acc2.astype(edt) + b2_ref[...], 0).astype(cdt)

    # Layer 3, transposed: (1,256) x (TB,256) contracted over 256 -> (1, TB).
    # Keeps the output store lane-dense (last dim = TB) instead of a (TB, 1)
    # column hitting masked partial stores.
    qT = lax.dot_general(w3_ref[...], h2,
                         dimension_numbers=(((1,), (1,)), ((), ())),
                         preferred_element_type=jnp.float32)
    o_ref[...] = (qT + b3_ref[...]).astype(o_ref.dtype)


def _choose_tile(batch, requested):
    """Pick a batch tile: multiple of 128, no over-padding, grid_b >= 2."""
    tb = max(128, (int(requested) // 128) * 128)
    # Never pad the batch past the next multiple of 128.
    tb = min(tb, pl.cdiv(batch, 128) * 128)
    # The ("parallel",) batch axis only engages both v7x TensorCores with
    # >= 2 grid steps; shrink the tile for moderate batches instead of
    # collapsing the whole batch into one step.
    if batch > 128:
        tb = min(tb, pl.cdiv(pl.cdiv(batch, 2), 128) * 128)
    return tb


def prepare_params(params, *, compute_dtype=jnp.bfloat16,
                   epilogue_dtype=jnp.float32):
    """Cast weights ONCE (not per forward call).

    compute_dtype: MXU input dtype for weights/activations (bf16 is the native
      fast path on v5e/v6e/v7x; accumulation is always f32).
    epilogue_dtype: dtype of biases / bias+ReLU math. Keep f32 on v5e (no bf16
      VPU); bf16 on v6e/v7x halves intermediate traffic/VMEM.
    """
    w1_s, w1_a, b1, w2, b2, w3, b3 = params
    return (w1_s.astype(compute_dtype), w1_a.astype(compute_dtype),
            b1.astype(epilogue_dtype),
            w2.astype(compute_dtype), b2.astype(epilogue_dtype),
            w3.astype(compute_dtype), b3.astype(jnp.float32))


def ddpg_critic_forward(states, actions, prepared_params, *, tile_b=1024):
    """DDPG critic q(s, a): states (B,S), actions (B,A) -> (B,1) float32."""
    w1_s, w1_a, b1, w2, b2, w3, b3 = prepared_params
    B, S = states.shape
    A = actions.shape[1]

    tb = _choose_tile(B, tile_b)
    Bp = pl.cdiv(B, tb) * tb
    if Bp != B:
        # Dense (tb, .) blocks every grid step; padded rows sliced off below.
        states = jnp.pad(states, ((0, Bp - B), (0, 0)))
        actions = jnp.pad(actions, ((0, Bp - B), (0, 0)))
    grid_b = Bp // tb

    d_in = S + A
    flops = 2 * Bp * (d_in * HIDDEN + HIDDEN * HIDDEN + HIDDEN)
    bytes_accessed = (
        states.size * states.dtype.itemsize
        + actions.size * actions.dtype.itemsize
        + sum(int(p.size) * p.dtype.itemsize for p in prepared_params)
        + Bp * 4)

    const2 = lambda i: (0, 0)  # weights/biases: DMA'd once, VMEM-resident

    out = pl.pallas_call(
        _critic_kernel,
        out_shape=jax.ShapeDtypeStruct((1, Bp), jnp.float32),
        grid=(grid_b,),
        in_specs=[
            pl.BlockSpec((tb, S), lambda i: (i, 0)),   # states tile
            pl.BlockSpec((tb, A), lambda i: (i, 0)),   # actions tile
            pl.BlockSpec((S, HIDDEN), const2),         # W1 rows for states
            pl.BlockSpec((A, HIDDEN), const2),         # W1 rows for actions
            pl.BlockSpec((1, HIDDEN), const2),         # b1
            pl.BlockSpec((HIDDEN, HIDDEN), const2),    # W2
            pl.BlockSpec((1, HIDDEN), const2),         # b2
            pl.BlockSpec((1, HIDDEN), const2),         # W3 (out, in) layout
            pl.BlockSpec((1, 1), const2),              # b3
        ],
        # (1, Bp) output: leading dim 1 == full dim, lane dim tiled in
        # 128-multiples -> legal and lane-dense for any grid_b.
        out_specs=pl.BlockSpec((1, tb), lambda i: (0, i)),
        compiler_params=pltpu.CompilerParams(
            dimension_semantics=("parallel",),
            vmem_limit_bytes=32 * 1024 * 1024),
        cost_estimate=pl.CostEstimate(flops=flops, transcendentals=0,
                                      bytes_accessed=bytes_accessed),
    )(states, actions, w1_s, w1_a, b1, w2, b2, w3, b3)

    # Drop batch padding, restore (B, 1).
    return out.reshape(-1)[:B].reshape(B, 1)


def init_params(key, state_dim, action_dim, hidden=HIDDEN):
    """PyTorch-style uniform(+/- 1/sqrt(fan_in)) init, f32 master params.

    W1 is stored split along its input axis (state rows / action rows) so the
    kernel can fuse the states/actions concat; W3 stays in PyTorch (out, in)
    layout (1, hidden) for the lane-dense transposed final matmul."""
    d_in = state_dim + action_dim
    k1w, k1b, k2w, k2b, k3w, k3b = jax.random.split(key, 6)

    bnd1 = 1.0 / jnp.sqrt(d_in)
    w1 = jax.random.uniform(k1w, (d_in, hidden), jnp.float32, -bnd1, bnd1)
    b1 = jax.random.uniform(k1b, (1, hidden), jnp.float32, -bnd1, bnd1)

    bnd2 = 1.0 / jnp.sqrt(hidden)
    w2 = jax.random.uniform(k2w, (hidden, hidden), jnp.float32, -bnd2, bnd2)
    b2 = jax.random.uniform(k2b, (1, hidden), jnp.float32, -bnd2, bnd2)

    w3 = jax.random.uniform(k3w, (1, hidden), jnp.float32, -bnd2, bnd2)
    b3 = jax.random.uniform(k3b, (1, 1), jnp.float32, -bnd2, bnd2)

    return (w1[:state_dim], w1[state_dim:], b1, w2, b2, w3, b3)


def _reference_forward(states, actions, params):
    w1_s, w1_a, b1, w2, b2, w3, b3 = params
    x = jnp.concatenate([states, actions], axis=-1)
    w1 = jnp.concatenate([w1_s, w1_a], axis=0)
    h1 = jnp.maximum(x @ w1 + b1, 0.0)
    h2 = jnp.maximum(h1 @ w2 + b2, 0.0)
    return h2 @ w3.T + b3


if __name__ == "__main__":
    key = jax.random.PRNGKey(0)
    k_s1, k_a1, k_s2, k_a2, k_p = jax.random.split(key, 5)

    state_dim, action_dim = 16, 8
    params = init_params(k_p, state_dim, action_dim)           # f32 masters
    params_f32 = prepare_params(params, compute_dtype=jnp.float32)
    params_bf16 = prepare_params(params)                       # bf16 default

    # Case 1: small, non-tile-aligned batch (padding path, grid_b == 1).
    b1_ = 37
    s1 = jax.random.normal(k_s1, (b1_, state_dim), jnp.float32)
    a1 = jax.random.normal(k_a1, (b1_, action_dim), jnp.float32)
    q_ref1 = _reference_forward(s1, a1, params)

    q1 = jax.block_until_ready(ddpg_critic_forward(s1, a1, params_f32))
    assert q1.shape == (b1_, 1)
    assert jnp.allclose(q1, q_ref1, atol=1e-4, rtol=1e-4), \
        float(jnp.max(jnp.abs(q1 - q_ref1)))

    q1b = jax.block_until_ready(ddpg_critic_forward(s1, a1, params_bf16))
    assert q1b.shape == (b1_, 1)
    assert jnp.allclose(q1b, q_ref1, atol=1e-1, rtol=1e-1)

    # Case 2: batch large enough that the adaptive tile gives grid_b >= 2
    # (exercises the (1, Bp) lane-dense output layout across multiple tiles
    # and the megacore "parallel" batch split on v7x).
    b2_ = 300
    s2 = jax.random.normal(k_s2, (b2_, state_dim), jnp.float32)
    a2 = jax.random.normal(k_a2, (b2_, action_dim), jnp.float32)
    q_ref2 = _reference_forward(s2, a2, params)

    q2 = jax.block_until_ready(ddpg_critic_forward(s2, a2, params_f32))
    assert q2.shape == (b2_, 1)
    assert jnp.allclose(q2, q_ref2, atol=1e-4, rtol=1e-4), \
        float(jnp.max(jnp.abs(q2 - q_ref2)))

    print("KERNEL_OK")
</pallas_src>

<mosaic_0001>
module attributes {stable_mosaic.version = 11 : i64} {
  func.func @_critic_kernel(%arg0: i32, %arg1: memref<128x16xf32, #tpu.memory_space<vmem>>, %arg2: memref<128x8xf32, #tpu.memory_space<vmem>>, %arg3: memref<16x256xf32, #tpu.memory_space<vmem>>, %arg4: memref<8x256xf32, #tpu.memory_space<vmem>>, %arg5: memref<1x256xf32, #tpu.memory_space<vmem>>, %arg6: memref<256x256xf32, #tpu.memory_space<vmem>>, %arg7: memref<1x256xf32, #tpu.memory_space<vmem>>, %arg8: memref<1x256xf32, #tpu.memory_space<vmem>>, %arg9: memref<1x1xf32, #tpu.memory_space<vmem>>, %arg10: memref<1x128xf32, #tpu.memory_space<vmem>>) attributes {dimension_semantics = [#tpu.dimension_semantics<parallel>], iteration_bounds = array<i64: 1>, scalar_prefetch = 0 : i64, scratch_operands = 0 : i64, tpu.core_type = #tpu.core_type<tc>, window_params = [{transform_indices = @transform_0, window_bounds = array<i64: 128, 16>}, {transform_indices = @transform_1, window_bounds = array<i64: 128, 8>}, {pipeline_mode = #tpu.pipeline_mode<synchronous>, transform_indices = @transform_2, window_bounds = array<i64: 16, 256>}, {pipeline_mode = #tpu.pipeline_mode<synchronous>, transform_indices = @transform_3, window_bounds = array<i64: 8, 256>}, {pipeline_mode = #tpu.pipeline_mode<synchronous>, transform_indices = @transform_4, window_bounds = array<i64: 1, 256>}, {pipeline_mode = #tpu.pipeline_mode<synchronous>, transform_indices = @transform_5, window_bounds = array<i64: 256, 256>}, {pipeline_mode = #tpu.pipeline_mode<synchronous>, transform_indices = @transform_6, window_bounds = array<i64: 1, 256>}, {pipeline_mode = #tpu.pipeline_mode<synchronous>, transform_indices = @transform_7, window_bounds = array<i64: 1, 256>}, {pipeline_mode = #tpu.pipeline_mode<synchronous>, transform_indices = @transform_8, window_bounds = array<i64: 1, 1>}, {transform_indices = @transform_9, window_bounds = array<i64: 1, 128>}]} {
    %c0 = arith.constant 0 : index
    %c0_0 = arith.constant 0 : index
    %0 = vector.load %arg1[%c0, %c0_0] : memref<128x16xf32, #tpu.memory_space<vmem>>, vector<128x16xf32>
    %c0_1 = arith.constant 0 : index
    %c0_2 = arith.constant 0 : index
    %1 = vector.load %arg2[%c0_1, %c0_2] : memref<128x8xf32, #tpu.memory_space<vmem>>, vector<128x8xf32>
    %c0_3 = arith.constant 0 : index
    %c0_4 = arith.constant 0 : index
    %2 = vector.load %arg3[%c0_3, %c0_4] : memref<16x256xf32, #tpu.memory_space<vmem>>, vector<16x256xf32>
    %cst = arith.constant dense<0.000000e+00> : vector<128x256xf32>
    %3 = tpu.matmul %0, %2, %cst {dimension_numbers = #tpu.dot_dimension_numbers<[1], [0], [0], [1], [0, 0, 1, 1], [], []>} : vector<128x16xf32>, vector<16x256xf32>, vector<128x256xf32> -> vector<128x256xf32>
    %c0_5 = arith.constant 0 : index
    %c0_6 = arith.constant 0 : index
    %4 = vector.load %arg4[%c0_5, %c0_6] : memref<8x256xf32, #tpu.memory_space<vmem>>, vector<8x256xf32>
    %cst_7 = arith.constant dense<0.000000e+00> : vector<128x256xf32>
    %5 = tpu.matmul %1, %4, %cst_7 {dimension_numbers = #tpu.dot_dimension_numbers<[1], [0], [0], [1], [0, 0, 1, 1], [], []>} : vector<128x8xf32>, vector<8x256xf32>, vector<128x256xf32> -> vector<128x256xf32>
    %6 = arith.addf %3, %5 : vector<128x256xf32>
    %c0_8 = arith.constant 0 : index
    %c0_9 = arith.constant 0 : index
    %7 = vector.load %arg5[%c0_8, %c0_9] : memref<1x256xf32, #tpu.memory_space<vmem>>, vector<1x256xf32>
    %8 = vector.broadcast %7 : vector<1x256xf32> to vector<128x256xf32>
    %9 = arith.addf %6, %8 : vector<128x256xf32>
    %cst_10 = arith.constant 0.000000e+00 : f32
    %10 = vector.broadcast %cst_10 : f32 to vector<128x256xf32>
    %11 = arith.maximumf %9, %10 : vector<128x256xf32>
    %c0_11 = arith.constant 0 : index
    %c0_12 = arith.constant 0 : index
    %12 = vector.load %arg6[%c0_11, %c0_12] : memref<256x256xf32, #tpu.memory_space<vmem>>, vector<256x256xf32>
    %cst_13 = arith.constant dense<0.000000e+00> : vector<128x256xf32>
    %13 = tpu.matmul %11, %12, %cst_13 {dimension_numbers = #tpu.dot_dimension_numbers<[1], [0], [0], [1], [0, 0, 1, 1], [], []>} : vector<128x256xf32>, vector<256x256xf32>, vector<128x256xf32> -> vector<128x256xf32>
    %c0_14 = arith.constant 0 : index
    %c0_15 = arith.constant 0 : index
    %14 = vector.load %arg7[%c0_14, %c0_15] : memref<1x256xf32, #tpu.memory_space<vmem>>, vector<1x256xf32>
    %15 = vector.broadcast %14 : vector<1x256xf32> to vector<128x256xf32>
    %16 = arith.addf %13, %15 : vector<128x256xf32>
    %cst_16 = arith.constant 0.000000e+00 : f32
    %17 = vector.broadcast %cst_16 : f32 to vector<128x256xf32>
    %18 = arith.maximumf %16, %17 : vector<128x256xf32>
    %c0_17 = arith.constant 0 : index
    %c0_18 = arith.constant 0 : index
    %19 = vector.load %arg8[%c0_17, %c0_18] : memref<1x256xf32, #tpu.memory_space<vmem>>, vector<1x256xf32>
    %cst_19 = arith.constant dense<0.000000e+00> : vector<1x128xf32>
    %20 = tpu.matmul %19, %18, %cst_19 {dimension_numbers = #tpu.dot_dimension_numbers<[1], [1], [0], [0], [0, 0, 1, 0], [], []>} : vector<1x256xf32>, vector<128x256xf32>, vector<1x128xf32> -> vector<1x128xf32>
    %c0_20 = arith.constant 0 : index
    %c0_21 = arith.constant 0 : index
    %21 = vector.load %arg9[%c0_20, %c0_21] : memref<1x1xf32, #tpu.memory_space<vmem>>, vector<1x1xf32>
    %22 = vector.broadcast %21 : vector<1x1xf32> to vector<1x128xf32>
    %23 = arith.addf %20, %22 : vector<1x128xf32>
    %c0_22 = arith.constant 0 : index
    %c0_23 = arith.constant 0 : index
    %24 = vector.load %arg10[%c0_22, %c0_23] : memref<1x128xf32, #tpu.memory_space<vmem>>, vector<1x128xf32>
    tpu.vector_store %arg10[%c0_22, %c0_23], %23 {strides = array<i32>} : memref<1x128xf32, #tpu.memory_space<vmem>>, vector<1x128xf32>,
    return
  }
  func.func @transform_0(%arg0: i32) -> (i32, i32) {
    %c0_i32 = arith.constant 0 : i32
    %c0_i32_0 = arith.constant 0 : i32
    return %arg0, %c0_i32 : i32, i32
  }
  func.func @transform_1(%arg0: i32) -> (i32, i32) {
    %c0_i32 = arith.constant 0 : i32
    %c0_i32_0 = arith.constant 0 : i32
    return %arg0, %c0_i32 : i32, i32
  }
  func.func @transform_2(%arg0: i32) -> (i32, i32) {
    %c0_i32 = arith.constant 0 : i32
    %c0_i32_0 = arith.constant 0 : i32
    %c0_i32_1 = arith.constant 0 : i32
    return %c0_i32, %c0_i32_0 : i32, i32
  }
  func.func @transform_3(%arg0: i32) -> (i32, i32) {
    %c0_i32 = arith.constant 0 : i32
    %c0_i32_0 = arith.constant 0 : i32
    %c0_i32_1 = arith.constant 0 : i32
    return %c0_i32, %c0_i32_0 : i32, i32
  }
  func.func @transform_4(%arg0: i32) -> (i32, i32) {
    %c0_i32 = arith.constant 0 : i32
    %c0_i32_0 = arith.constant 0 : i32
    %c0_i32_1 = arith.constant 0 : i32
    return %c0_i32, %c0_i32_0 : i32, i32
  }
  func.func @transform_5(%arg0: i32) -> (i32, i32) {
    %c0_i32 = arith.constant 0 : i32
    %c0_i32_0 = arith.constant 0 : i32
    %c0_i32_1 = arith.constant 0 : i32
    return %c0_i32, %c0_i32_0 : i32, i32
  }
  func.func @transform_6(%arg0: i32) -> (i32, i32) {
    %c0_i32 = arith.constant 0 : i32
    %c0_i32_0 = arith.constant 0 : i32
    %c0_i32_1 = arith.constant 0 : i32
    return %c0_i32, %c0_i32_0 : i32, i32
  }
  func.func @transform_7(%arg0: i32) -> (i32, i32) {
    %c0_i32 = arith.constant 0 : i32
    %c0_i32_0 = arith.constant 0 : i32
    %c0_i32_1 = arith.constant 0 : i32
    return %c0_i32, %c0_i32_0 : i32, i32
  }
  func.func @transform_8(%arg0: i32) -> (i32, i32) {
    %c0_i32 = arith.constant 0 : i32
    %c0_i32_0 = arith.constant 0 : i32
    %c0_i32_1 = arith.constant 0 : i32
    return %c0_i32, %c0_i32_0 : i32, i32
  }
  func.func @transform_9(%arg0: i32) -> (i32, i32) {
    %c0_i32 = arith.constant 0 : i32
    %c0_i32_0 = arith.constant 0 : i32
    return %c0_i32, %arg0 : i32, i32
  }
}

</mosaic_0001>

<bundles_post_ra>
// kernel: tpu_custom_call.1
= control target key start
LH: loop header
LB: loop body
LE: loop exit
PB: predicated region body
PF: predicated region fallthrough
CT: control target
= control target key end

     0   :  { %s1536_s0 = inlined_call_operand.vmem [shape: f32[128,16], index: 0, kind: input, shape index: {}]   ;;  %s1537_s1 = inlined_call_operand.vmem [shape: f32[128,8], index: 1, kind: input, shape index: {}]   ;;  %s1538_s2 = inlined_call_operand.vmem [shape: f32[16,256], index: 2, kind: input, shape index: {}]   ;;  %s1539_s3 = inlined_call_operand.vmem [shape: f32[8,256], index: 3, kind: input, shape index: {}]   ;;  %s1540_s4 = inlined_call_operand.vmem [shape: f32[1,256], index: 4, kind: input, shape index: {}]   ;;  %s1541_s5 = inlined_call_operand.hbm [shape: f32[256,256], index: 5, kind: input, shape index: {}]   ;;  %s1542_s6 = inlined_call_operand.vmem [shape: f32[1,256], index: 6, kind: input, shape index: {}]   ;;  %s1543_s7 = inlined_call_operand.vmem [shape: f32[1,256], index: 7, kind: input, shape index: {}]   ;;  %s1544_s8 = inlined_call_operand.<no memory space> [shape: f32[1,1], index: 8, kind: input, shape index: {}]   ;;  %s1545_s9 = inlined_call_operand.hbm [shape: f32[1,128], index: 9, kind: output, shape index: {}]  }
   0x1   :  { %v14_v0 = vstv %s1544_s8 }
   0x2   :  { %15 = vst [vmem:[#allocation2] sm:$0x1] %v14_v0 }
   0x3   :  { %16 = vsyncpa [#allocation4], 0 }
   0x4   :  { %17 = vsyncpa [#allocation5], 0  ;;  %s1179_s11 = smov [#allocation3]   ;;  %s1131_s15 = scalar_lea.hbm %s1541_s5, 8192 }
   0x5   :  { %s33_s12 = sshll.u32 %s1179_s11, 4  ;;  %p1132_p0 = scmp.ne.s32.totalorder %s1541_s5, %s1131_s15  ;;  %s34_s12 = int_to_ptr.vmem [resolvable:$true] %s33_s12 }
   0x6   :  { %p1135_p1 = scmp.lt.u32.totalorder %s1131_s15, %s1541_s5 }
   0x8   :  { %p1137_p2 = pnand %p1135_p1, %p1132_p0 }
   0xa   :  { %1140 = shalt.err (!%p1137_p2)
}
   0xb   :  { %s1141_s8 = scalar_lea.vmem %s34_s12, 8192  ;;  %p1146_p4 = scmp.lt.s32.totalorder %s34_s12, %s34_s12 }
   0xc   :  { %p1142_p3 = scmp.ne.s32.totalorder %s34_s12, %s1141_s8  ;;  %p1147_p5 = scmp.lt.s32.totalorder %s1141_s8, %s1141_s8 }
   0xe   :  { %p1148_p6 = por %p1147_p5, %p1146_p4 }
  0x10   :  { %p1149_p7 = pnand %p1148_p6, %p1142_p3 }
  0x12   :  { %1152 = shalt.err (!%p1149_p7)
}
  0x13   :  { %s1180_s20 = smov 256   ;;  %s1181_s21 = smov 16  }
  0x14   :  { %39 = dma.hbm_to_vmem [thread:$0]  %s1541_s5, 8192, %s34_s12, [#allocation4], %s1180_s20, %s1180_s20, %s1181_s21  }
  0x15   :  { %1175 = dma.done.wait [#allocation4], 8192  }
  0x16   :  { %1176 = vsyncadd [#allocation4], 4294959104  ;;  %v1182_v1 = vmov 0.0   ;;  %v86_v2 = vld [vmem:[%s1539_s3 + $0x8] sm:$0xff]  ;;  %v85_v3 = vld [vmem:[%s1539_s3] sm:$0xff]  ;;  %vm87_vm0 = vcmask 64512  }
  0x17   :  { %200 = vmatprep.mubr.f32.mxu0 %v1182_v1  ;;  %v65_v4 = vld [vmem:[%s1537_s1] sm:$0xff]  ;;  %136 = vmatprep.subr.mxu0 %v86_v2  ;;  %v82_v5 = vld [vmem:[%s1538_s2 + $0x8] sm:$0xff]  ;;  %v84_v6 = vld [vmem:[%s1538_s2 + $0x18] sm:$0xff]  ;;  %vm297_vm1 = vcmask 130048  }
  0x18   :  { %v81_v7 = vld [vmem:[%s1538_s2] sm:$0xff]  ;;  %137 = vmatpush1.msra.mxu0 %v85_v3  ;;  %v992_v8 = vpack.c.bf16 %v84_v6, %v82_v5  ;;  %v83_v9 = vld [vmem:[%s1538_s2 + $0x10] sm:$0xff]  ;;  %v66_v11 = vld [vmem:[%s1537_s1 + $0x8] sm:$0xff] }
  0x19   :  { %960 = vmatmul.mubr.msk.f32.vlgmr.msra.gmra.mrb[0].mxu0 %vm87_vm0, %v65_v4  ;;  %v994_v10 = vpack.c.bf16 %v83_v9, %v81_v7  ;;  %v67_v12 = vld [vmem:[%s1537_s1 + $0x10] sm:$0xff]  ;;  %v68_v13 = vld [vmem:[%s1537_s1 + $0x18] sm:$0xff]  ;;  %v583_v16 = vld [vmem:[#allocation3] sm:$0xff] }
  0x1a   :  { %993 = vmatprep.subr.bf16.mxu0 %v992_v8  ;;  %206 = vmatprep.mubr.f32.mxu0 %v1182_v1  ;;  %v584_v14 = vld [vmem:[#allocation3 + $0x8] sm:$0xff]  ;;  %v586_v15 = vld [vmem:[#allocation3 + $0x18] sm:$0xff]  ;;  %v585_v17 = vld [vmem:[#allocation3 + $0x10] sm:$0xff] }
  0x1b   :  { %995 = vmatpush1.bf16.msra.mxu0 %v994_v10  ;;  %v996_v18 = vpack.c.bf16 %v586_v15, %v584_v14  ;;  %v998_v19 = vpack.c.bf16 %v585_v17, %v583_v16  ;;  %v588_v20 = vld [vmem:[#allocation3 + $0x28] sm:$0xff]  ;;  %v590_v21 = vld [vmem:[#allocation3 + $0x38] sm:$0xff]  ;;  %v587_v22 = vld [vmem:[#allocation3 + $0x20] sm:$0xff] }
  0x1c   :  { %v1000_v23 = vpack.c.bf16 %v590_v21, %v588_v20  ;;  %v589_v24 = vld [vmem:[#allocation3 + $0x30] sm:$0xff]  ;;  %v592_v25 = vld [vmem:[#allocation3 + $0x48] sm:$0xff]  ;;  %v594_v26 = vld [vmem:[#allocation3 + $0x58] sm:$0xff] }
  0x1d   :  { %961 = vmatmul.mubr.msk.f32.gmra.mrb[2].mxu0 %vm87_vm0, %v66_v11  ;;  %v69_v27 = vld [vmem:[%s1537_s1 + $0x20] sm:$0xff]  ;;  %997 = vmatprep.subr.bf16.mxu1 %v996_v18  ;;  %v1002_v28 = vpack.c.bf16 %v589_v24, %v587_v22  ;;  %v1004_v29 = vpack.c.bf16 %v594_v26, %v592_v25  ;;  %v593_v31 = vld [vmem:[#allocation3 + $0x50] sm:$0xff]  ;;  %v596_v32 = vld [vmem:[#allocation3 + $0x68] sm:$0xff] }
  0x1e   :  { %212 = vmatprep.mubr.f32.mxu0 %v1182_v1  ;;  %999 = vmatpush1.bf16.msra.mxu1 %v998_v19  ;;  %v591_v30 = vld [vmem:[#allocation3 + $0x40] sm:$0xff]  ;;  %v598_v33 = vld [vmem:[#allocation3 + $0x78] sm:$0xff]  ;;  %v597_v38 = vld [vmem:[#allocation3 + $0x70] sm:$0xff] }
  0x1f   :  { %1001 = vmatprep.subr.bf16.mxu1 %v1000_v23  ;;  %v70_v34 = vld [vmem:[%s1537_s1 + $0x28] sm:$0xff]  ;;  %v1006_v35 = vpack.c.bf16 %v593_v31, %v591_v30  ;;  %v1008_v36 = vpack.c.bf16 %v598_v33, %v596_v32  ;;  %v602_v40 = vld [vmem:[#allocation3 + $0x98] sm:$0xff]  ;;  %v71_v41 = vld [vmem:[%s1537_s1 + $0x30] sm:$0xff] }
  0x20   :  { %v595_v37 = vld [vmem:[#allocation3 + $0x60] sm:$0xff]  ;;  %v600_v39 = vld [vmem:[#allocation3 + $0x88] sm:$0xff]  ;;  %v601_v45 = vld [vmem:[#allocation3 + $0x90] sm:$0xff] }
  0x21   :  { %962 = vmatmul.mubr.msk.f32.gmra.mrb[4].mxu0 %vm87_vm0, %v67_v12  ;;  %v1010_v42 = vpack.c.bf16 %v597_v38, %v595_v37  ;;  %v1012_v43 = vpack.c.bf16 %v602_v40, %v600_v39  ;;  %v599_v44 = vld [vmem:[#allocation3 + $0x80] sm:$0xff]  ;;  %v604_v46 = vld [vmem:[#allocation3 + $0xa8] sm:$0xff]  ;;  %v606_v47 = vld [vmem:[#allocation3 + $0xb8] sm:$0xff] }
  0x22   :  { %218 = vmatprep.mubr.f32.mxu0 %v1182_v1  ;;  %1003 = vmatpush1.bf16.msra.mxu1 %v1002_v28  ;;  %v72_v48 = vld [vmem:[%s1537_s1 + $0x38] sm:$0xff]  ;;  %v1014_v49 = vpack.c.bf16 %v601_v45, %v599_v44  ;;  %v1016_v50 = vpack.c.bf16 %v606_v47, %v604_v46  ;;  %v603_v51 = vld [vmem:[#allocation3 + $0xa0] sm:$0xff]  ;;  %v608_v53 = vld [vmem:[#allocation3 + $0xc8] sm:$0xff] }
  0x23   :  { %1005 = vmatprep.subr.bf16.mxu1 %v1004_v29  ;;  %v605_v52 = vld [vmem:[#allocation3 + $0xb0] sm:$0xff]  ;;  %v610_v54 = vld [vmem:[#allocation3 + $0xd8] sm:$0xff]  ;;  %v607_v58 = vld [vmem:[#allocation3 + $0xc0] sm:$0xff] }
  0x24   :  { %v73_v55 = vld [vmem:[%s1537_s1 + $0x40] sm:$0xff]  ;;  %v1018_v56 = vpack.c.bf16 %v605_v52, %v603_v51  ;;  %v1020_v57 = vpack.c.bf16 %v610_v54, %v608_v53  ;;  %v609_v59 = vld [vmem:[#allocation3 + $0xd0] sm:$0xff]  ;;  %v612_v60 = vld [vmem:[#allocation3 + $0xe8] sm:$0xff] }
  0x25   :  { %963 = vmatmul.mubr.msk.f32.gmra.mrb[6].mxu0 %vm87_vm0, %v68_v13  ;;  %v614_v61 = vld [vmem:[#allocation3 + $0xf8] sm:$0xff]  ;;  %v74_v62 = vld [vmem:[%s1537_s1 + $0x48] sm:$0xff]  ;;  %v1022_v63 = vpack.c.bf16 %v609_v59, %v607_v58  ;;  %v613_v3 = vld [vmem:[#allocation3 + $0xf0] sm:$0xff] }
  0x26   :  { %224 = vmatprep.mubr.f32.mxu0 %v1182_v1  ;;  %1007 = vmatpush1.bf16.msra.mxu1 %v1006_v35  ;;  %v1024_v0 = vpack.c.bf16 %v614_v61, %v612_v60  ;;  %v611_v2 = vld [vmem:[#allocation3 + $0xe0] sm:$0xff]  ;;  %v616_v4 = vld [vmem:[#allocation3 + $0x108] sm:$0xff]  ;;  %v618_v5 = vld [vmem:[#allocation3 + $0x118] sm:$0xff] }
  0x27   :  { %1009 = vmatprep.subr.bf16.mxu1 %v1008_v36  ;;  %v75_v6 = vld [vmem:[%s1537_s1 + $0x50] sm:$0xff]  ;;  %v1026_v7 = vpack.c.bf16 %v613_v3, %v611_v2  ;;  %v1028_v8 = vpack.c.bf16 %v618_v5, %v616_v4  ;;  %v615_v9 = vld [vmem:[#allocation3 + $0x100] sm:$0xff]  ;;  %v622_v12 = vld [vmem:[#allocation3 + $0x138] sm:$0xff] }
  0x28   :  { %v617_v10 = vld [vmem:[#allocation3 + $0x110] sm:$0xff]  ;;  %v620_v11 = vld [vmem:[#allocation3 + $0x128] sm:$0xff]  ;;  %v619_v16 = vld [vmem:[#allocation3 + $0x120] sm:$0xff] }
  0x29   :  { %964 = vmatmul.mubr.msk.f32.gmra.mrb[8].mxu0 %vm87_vm0, %v69_v27  ;;  %v76_v13 = vld [vmem:[%s1537_s1 + $0x58] sm:$0xff]  ;;  %v1030_v14 = vpack.c.bf16 %v617_v10, %v615_v9  ;;  %v1032_v15 = vpack.c.bf16 %v622_v12, %v620_v11  ;;  %v624_v18 = vld [vmem:[#allocation3 + $0x148] sm:$0xff]  ;;  %v77_v20 = vld [vmem:[%s1537_s1 + $0x60] sm:$0xff]  ;;  %v509_v12 = vlaneseq }
  0x2a   :  { %230 = vmatprep.mubr.f32.mxu0 %v1182_v1  ;;  %1011 = vmatpush1.bf16.msra.mxu1 %v1010_v42  ;;  %v621_v17 = vld [vmem:[#allocation3 + $0x130] sm:$0xff]  ;;  %v626_v19 = vld [vmem:[#allocation3 + $0x158] sm:$0xff]  ;;  %v623_v23 = vld [vmem:[#allocation3 + $0x140] sm:$0xff] }
  0x2b   :  { %1013 = vmatprep.subr.bf16.mxu1 %v1012_v43  ;;  %v1034_v21 = vpack.c.bf16 %v621_v17, %v619_v16  ;;  %v1036_v22 = vpack.c.bf16 %v626_v19, %v624_v18  ;;  %v625_v24 = vld [vmem:[#allocation3 + $0x150] sm:$0xff]  ;;  %v628_v25 = vld [vmem:[#allocation3 + $0x168] sm:$0xff]  ;;  %v630_v26 = vld [vmem:[#allocation3 + $0x178] sm:$0xff] }
  0x2c   :  { %v78_v27 = vld [vmem:[%s1537_s1 + $0x68] sm:$0xff]  ;;  %v1038_v28 = vpack.c.bf16 %v625_v24, %v623_v23  ;;  %v1040_v29 = vpack.c.bf16 %v630_v26, %v628_v25  ;;  %v629_v31 = vld [vmem:[#allocation3 + $0x170] sm:$0xff]  ;;  %v634_v33 = vld [vmem:[#allocation3 + $0x198] sm:$0xff] }
  0x2d   :  { %965 = vmatmul.mubr.msk.f32.gmra.mrb[10].mxu0 %vm87_vm0, %v70_v34  ;;  %v627_v30 = vld [vmem:[#allocation3 + $0x160] sm:$0xff]  ;;  %v632_v32 = vld [vmem:[#allocation3 + $0x188] sm:$0xff]  ;;  %v633_v38 = vld [vmem:[#allocation3 + $0x190] sm:$0xff] }
  0x2e   :  { %236 = vmatprep.mubr.f32.mxu0 %v1182_v1  ;;  %1015 = vmatpush1.bf16.msra.mxu1 %v1014_v49  ;;  %v79_v34 = vld [vmem:[%s1537_s1 + $0x70] sm:$0xff]  ;;  %v1042_v35 = vpack.c.bf16 %v629_v31, %v627_v30  ;;  %v1044_v36 = vpack.c.bf16 %v634_v33, %v632_v32  ;;  %v631_v37 = vld [vmem:[#allocation3 + $0x180] sm:$0xff]  ;;  %v638_v40 = vld [vmem:[#allocation3 + $0x1b8] sm:$0xff] }
  0x2f   :  { %1017 = vmatprep.subr.bf16.mxu1 %v1016_v50  ;;  %v636_v39 = vld [vmem:[#allocation3 + $0x1a8] sm:$0xff]  ;;  %v1046_v42 = vpack.c.bf16 %v633_v38, %v631_v37  ;;  %v635_v44 = vld [vmem:[#allocation3 + $0x1a0] sm:$0xff]  ;;  %v637_v45 = vld [vmem:[#allocation3 + $0x1b0] sm:$0xff] }
  0x30   :  { %v1048_v43 = vpack.c.bf16 %v638_v40, %v636_v39  ;;  %v640_v46 = vld [vmem:[#allocation3 + $0x1c8] sm:$0xff]  ;;  %v642_v47 = vld [vmem:[#allocation3 + $0x1d8] sm:$0xff]  ;;  %v1050_v49 = vpack.c.bf16 %v637_v45, %v635_v44  ;;  %v639_v3 = vld [vmem:[#allocation3 + $0x1c0] sm:$0xff] }
  0x31   :  { %966 = vmatmul.mubr.msk.f32.gmra.mrb[12].mxu0 %vm87_vm0, %v71_v41  ;;  %v80_v41 = vld [vmem:[%s1537_s1 + $0x78] sm:$0xff]  ;;  %v1052_v50 = vpack.c.bf16 %v642_v47, %v640_v46  ;;  %v50_v51 = vld [vmem:[%s1536_s0 + $0x8] sm:$0xff]  ;;  %v51_v52 = vld [vmem:[%s1536_s0 + $0x10] sm:$0xff] }
  0x32   :  { %242 = vmatprep.mubr.f32.mxu0 %v1182_v1  ;;  %1019 = vmatpush1.bf16.msra.mxu1 %v1018_v56  ;;  %v52_v53 = vld [vmem:[%s1536_s0 + $0x18] sm:$0xff]  ;;  %v53_v54 = vld [vmem:[%s1536_s0 + $0x20] sm:$0xff]  ;;  %v55_v56 = vld [vmem:[%s1536_s0 + $0x30] sm:$0xff] }
  0x33   :  { %1021 = vmatprep.subr.bf16.mxu1 %v1020_v57  ;;  %v56_v57 = vld [vmem:[%s1536_s0 + $0x38] sm:$0xff]  ;;  %v57_v58 = vld [vmem:[%s1536_s0 + $0x40] sm:$0xff]  ;;  %v58_v59 = vld [vmem:[%s1536_s0 + $0x48] sm:$0xff] }
  0x34   :  { %v59_v60 = vld [vmem:[%s1536_s0 + $0x50] sm:$0xff]  ;;  %v60_v61 = vld [vmem:[%s1536_s0 + $0x58] sm:$0xff]  ;;  %v643_v9 = vld [vmem:[#allocation3 + $0x1e0] sm:$0xff] }
  0x35   :  { %967 = vmatmul.mubr.msk.f32.gmra.mrb[14].mxu0 %vm87_vm0, %v72_v48  ;;  %v49_v48 = vld [vmem:[%s1536_s0] sm:$0xff]  ;;  %v64_v2 = vld [vmem:[%s1536_s0 + $0x78] sm:$0xff] }
  0x36   :  { %248 = vmatprep.mubr.f32.mxu0 %v1182_v1  ;;  %1023 = vmatpush1.bf16.msra.mxu1 %v1022_v63  ;;  %v62_v63 = vld [vmem:[%s1536_s0 + $0x68] sm:$0xff]  ;;  %v641_v4 = vld [vmem:[#allocation3 + $0x1d0] sm:$0xff] }
  0x37   :  { %1025 = vmatprep.subr.bf16.mxu1 %v1024_v0  ;;  %v63_v0 = vld [vmem:[%s1536_s0 + $0x70] sm:$0xff]  ;;  %v1054_v5 = vpack.c.bf16 %v641_v4, %v639_v3 }
  0x38   :  { %v645_v10 = vld [vmem:[#allocation3 + $0x1f0] sm:$0xff] }
  0x39   :  { %968 = vmatmul.mubr.msk.f32.gmra.mrb[16].mxu0 %vm87_vm0, %v73_v55  ;;  %v54_v55 = vld [vmem:[%s1536_s0 + $0x28] sm:$0xff]  ;;  %v1058_v11 = vpack.c.bf16 %v645_v10, %v643_v9 }
  0x3a   :  { %254 = vmatprep.mubr.f32.mxu0 %v1182_v1  ;;  %1027 = vmatpush1.bf16.msra.mxu1 %v1026_v7  ;;  %v646_v7 = vld [vmem:[#allocation3 + $0x1f8] sm:$0xff] }
  0x3b   :  { %1029 = vmatprep.subr.bf16.mxu1 %v1028_v8 }
  0x3d   :  { %969 = vmatmul.mubr.msk.f32.gmra.mrb[18].mxu0 %vm87_vm0, %v74_v62  ;;  %v61_v62 = vld [vmem:[%s1536_s0 + $0x60] sm:$0xff] }
  0x3e   :  { %260 = vmatprep.mubr.f32.mxu0 %v1182_v1  ;;  %1031 = vmatpush1.bf16.msra.mxu1 %v1030_v14  ;;  %v507_v14 = vld [vmem:[%s1540_s4] sm:$0x3] }
  0x3f   :  { %1033 = vmatprep.subr.bf16.mxu1 %v1032_v15 }
  0x41   :  { %970 = vmatmul.mubr.msk.f32.gmra.mrb[20].mxu0 %vm87_vm0, %v75_v6  ;;  %v644_v6 = vld [vmem:[#allocation3 + $0x1e8] sm:$0xff] }
  0x42   :  { %266 = vmatprep.mubr.f32.mxu0 %v1182_v1  ;;  %1035 = vmatpush1.bf16.msra.mxu1 %v1034_v21  ;;  %v1056_v8 = vpack.c.bf16 %v646_v7, %v644_v6 }
  0x43   :  { %1037 = vmatprep.subr.bf16.mxu1 %v1036_v22 }
  0x45   :  { %971 = vmatmul.mubr.msk.f32.gmra.mrb[22].mxu0 %vm87_vm0, %v76_v13 }
  0x46   :  { %272 = vmatprep.mubr.f32.mxu0 %v1182_v1  ;;  %1039 = vmatpush1.bf16.msra.mxu1 %v1038_v28 }
  0x47   :  { %1041 = vmatprep.subr.bf16.mxu1 %v1040_v29 }
  0x49   :  { %972 = vmatmul.mubr.msk.f32.gmra.mrb[24].mxu0 %vm87_vm0, %v77_v20 }
  0x4a   :  { %278 = vmatprep.mubr.f32.mxu0 %v1182_v1  ;;  %1043 = vmatpush1.bf16.msra.mxu1 %v1042_v35 }
  0x4b   :  { %1045 = vmatprep.subr.bf16.mxu1 %v1044_v36 }
  0x4d   :  { %973 = vmatmul.mubr.msk.f32.gmra.mrb[26].mxu0 %vm87_vm0, %v78_v27 }
  0x4e   :  { %284 = vmatprep.mubr.f32.mxu0 %v1182_v1  ;;  %1047 = vmatpush1.bf16.msra.mxu1 %v1046_v42 }
  0x4f   :  { %1049 = vmatprep.subr.bf16.mxu1 %v1048_v43 }
  0x51   :  { %974 = vmatmul.mubr.msk.f32.gmra.mrb[28].mxu0 %vm87_vm0, %v79_v34 }
  0x52   :  { %290 = vmatprep.mubr.f32.mxu0 %v1182_v1  ;;  %1051 = vmatpush1.bf16.msra.mxu1 %v1050_v49 }
  0x53   :  { %1053 = vmatprep.subr.bf16.mxu1 %v1052_v50 }
  0x55   :  { %975 = vmatmul.mubr.msk.f32.gmra.mrb[30].mxu0 %vm87_vm0, %v80_v41 }
  0x56   :  { %410 = vmatprep.mubr.f32.mxu0 %v1182_v1  ;;  %1055 = vmatpush1.bf16.msra.mxu1 %v1054_v5 }
  0x57   :  { %1057 = vmatprep.subr.bf16.mxu1 %v1056_v8 }
  0x59   :  { %976 = vmatmul.mubr.msk.f32.vlgmr.msra.gmra.mrb[0].mxu0 %vm297_vm1, %v49_v48 }
  0x5a   :  { %416 = vmatprep.mubr.f32.mxu0 %v1182_v1  ;;  %1059 = vmatpush1.bf16.msra.mxu1 %v1058_v11 }
  0x5d   :  { %977 = vmatmul.mubr.msk.f32.gmra.mrb[2].mxu0 %vm297_vm1, %v50_v51 }
  0x5e   :  { %422 = vmatprep.mubr.f32.mxu0 %v1182_v1 }
  0x61   :  { %978 = vmatmul.mubr.msk.f32.gmra.mrb[4].mxu0 %vm297_vm1, %v51_v52 }
  0x62   :  { %428 = vmatprep.mubr.f32.mxu0 %v1182_v1 }
  0x65   :  { %979 = vmatmul.mubr.msk.f32.gmra.mrb[6].mxu0 %vm297_vm1, %v52_v53 }
  0x66   :  { %434 = vmatprep.mubr.f32.mxu0 %v1182_v1 }
  0x69   :  { %980 = vmatmul.mubr.msk.f32.gmra.mrb[8].mxu0 %vm297_vm1, %v53_v54 }
  0x6a   :  { %440 = vmatprep.mubr.f32.mxu0 %v1182_v1 }
  0x6d   :  { %981 = vmatmul.mubr.msk.f32.gmra.mrb[10].mxu0 %vm297_vm1, %v54_v55 }
  0x6e   :  { %446 = vmatprep.mubr.f32.mxu0 %v1182_v1 }
  0x71   :  { %982 = vmatmul.mubr.msk.f32.gmra.mrb[12].mxu0 %vm297_vm1, %v55_v56 }
  0x72   :  { %452 = vmatprep.mubr.f32.mxu0 %v1182_v1 }
  0x75   :  { %983 = vmatmul.mubr.msk.f32.gmra.mrb[14].mxu0 %vm297_vm1, %v56_v57 }
  0x76   :  { %458 = vmatprep.mubr.f32.mxu0 %v1182_v1 }
  0x79   :  { %984 = vmatmul.mubr.msk.f32.gmra.mrb[16].mxu0 %vm297_vm1, %v57_v58 }
  0x7a   :  { %464 = vmatprep.mubr.f32.mxu0 %v1182_v1 }
  0x7d   :  { %985 = vmatmul.mubr.msk.f32.gmra.mrb[18].mxu0 %vm297_vm1, %v58_v59 }
  0x7e   :  { %470 = vmatprep.mubr.f32.mxu0 %v1182_v1 }
  0x81   :  { %986 = vmatmul.mubr.msk.f32.gmra.mrb[20].mxu0 %vm297_vm1, %v59_v60 }
  0x82   :  { %476 = vmatprep.mubr.f32.mxu0 %v1182_v1 }
  0x85   :  { %987 = vmatmul.mubr.msk.f32.gmra.mrb[22].mxu0 %vm297_vm1, %v60_v61 }
  0x86   :  { %482 = vmatprep.mubr.f32.mxu0 %v1182_v1 }
  0x89   :  { %988 = vmatmul.mubr.msk.f32.gmra.mrb[24].mxu0 %vm297_vm1, %v61_v62 }
  0x8a   :  { %488 = vmatprep.mubr.f32.mxu0 %v1182_v1 }
  0x8d   :  { %989 = vmatmul.mubr.msk.f32.gmra.mrb[26].mxu0 %vm297_vm1, %v62_v63 }
  0x8e   :  { %494 = vmatprep.mubr.f32.mxu0 %v1182_v1 }
  0x91   :  { %990 = vmatmul.mubr.msk.f32.gmra.mrb[28].mxu0 %vm297_vm1, %v63_v0 }
  0x92   :  { %500 = vmatprep.mubr.f32.mxu0 %v1182_v1  ;;  %v510_v1 = vshrl.u32 %v509_v12, 7 }
  0x94   :  { %v1428_v13 = vsub.s32 0, %v510_v1  ;;  %v1433_v15 = vsub.s32 1, %v510_v1 }
  0x95   :  { %991 = vmatmul.mubr.msk.f32.gmra.mrb[30].mxu0 %vm297_vm1, %v64_v2 }
  0x96   :  { %v1436_v16 = vrot.slane %v507_v14, %v1428_v13  ;;  %v1439_v17 = vrot.slane %v507_v14, %v1433_v15 }
 0x12c   :  { %v412_v18 = vpop.f32.mrb[0].mxu0 }
 0x12d   :  { %v519_v19 = vadd.f32 %v1436_v16, %v412_v18  ;;  %v414_v20 = vpop.f32.mrb[1].mxu0 }
 0x12e   :  { %v520_v21 = vadd.f32 %v1439_v17, %v414_v20 }
 0x12f   :  { %v551_v24 = vmax.f32 %v519_v19, 0.0 }
 0x130   :  { %v418_v22 = vpop.f32.mrb[2].mxu0  ;;  %v552_v23 = vmax.f32 %v520_v21, 0.0 }
 0x131   :  { %v521_v25 = vadd.f32 %v1436_v16, %v418_v22  ;;  %v420_v26 = vpop.f32.mrb[3].mxu0 }
 0x132   :  { %v522_v27 = vadd.f32 %v1439_v17, %v420_v26  ;;  %723 = vmatprep.mubr.f32.mxu1 %v552_v23 }
 0x133   :  { %724 = vmatmul.mubr.f32.vlgmr.msra.gmra.mrb[0].mxu1 %v551_v24  ;;  %v553_v30 = vmax.f32 %v521_v25, 0.0 }
 0x134   :  { %v554_v28 = vmax.f32 %v522_v27, 0.0  ;;  %v424_v29 = vpop.f32.mrb[4].mxu0 }
 0x135   :  { %v523_v31 = vadd.f32 %v1436_v16, %v424_v29  ;;  %v426_v32 = vpop.f32.mrb[5].mxu0 }
 0x136   :  { %v524_v33 = vadd.f32 %v1439_v17, %v426_v32  ;;  %729 = vmatprep.mubr.f32.mxu1 %v554_v28 }
 0x137   :  { %730 = vmatmul.mubr.f32.gmra.mrb[2].mxu1 %v553_v30  ;;  %v555_v36 = vmax.f32 %v523_v31, 0.0 }
 0x138   :  { %v556_v34 = vmax.f32 %v524_v33, 0.0  ;;  %v430_v35 = vpop.f32.mrb[6].mxu0 }
 0x139   :  { %v525_v37 = vadd.f32 %v1436_v16, %v430_v35  ;;  %v432_v38 = vpop.f32.mrb[7].mxu0 }
 0x13a   :  { %v526_v39 = vadd.f32 %v1439_v17, %v432_v38  ;;  %735 = vmatprep.mubr.f32.mxu1 %v556_v34 }
 0x13b   :  { %736 = vmatmul.mubr.f32.gmra.mrb[4].mxu1 %v555_v36  ;;  %v557_v42 = vmax.f32 %v525_v37, 0.0 }
 0x13c   :  { %v558_v40 = vmax.f32 %v526_v39, 0.0  ;;  %v436_v41 = vpop.f32.mrb[8].mxu0 }
 0x13d   :  { %v527_v43 = vadd.f32 %v1436_v16, %v436_v41  ;;  %v438_v44 = vpop.f32.mrb[9].mxu0 }
 0x13e   :  { %v528_v45 = vadd.f32 %v1439_v17, %v438_v44  ;;  %741 = vmatprep.mubr.f32.mxu1 %v558_v40 }
 0x13f   :  { %742 = vmatmul.mubr.f32.gmra.mrb[6].mxu1 %v557_v42  ;;  %v559_v48 = vmax.f32 %v527_v43, 0.0 }
 0x140   :  { %v560_v46 = vmax.f32 %v528_v45, 0.0  ;;  %v442_v47 = vpop.f32.mrb[10].mxu0 }
 0x141   :  { %v529_v49 = vadd.f32 %v1436_v16, %v442_v47  ;;  %v444_v50 = vpop.f32.mrb[11].mxu0 }
 0x142   :  { %v530_v51 = vadd.f32 %v1439_v17, %v444_v50  ;;  %747 = vmatprep.mubr.f32.mxu1 %v560_v46 }
 0x143   :  { %748 = vmatmul.mubr.f32.gmra.mrb[8].mxu1 %v559_v48  ;;  %v561_v54 = vmax.f32 %v529_v49, 0.0 }
 0x144   :  { %v562_v52 = vmax.f32 %v530_v51, 0.0  ;;  %v448_v53 = vpop.f32.mrb[12].mxu0 }
 0x145   :  { %v531_v55 = vadd.f32 %v1436_v16, %v448_v53  ;;  %v450_v56 = vpop.f32.mrb[13].mxu0 }
 0x146   :  { %v532_v57 = vadd.f32 %v1439_v17, %v450_v56  ;;  %753 = vmatprep.mubr.f32.mxu1 %v562_v52  ;;  %v853_v56 = vld [vmem:[#allocation2] sm:$0x1] }
 0x147   :  { %754 = vmatmul.mubr.f32.gmra.mrb[10].mxu1 %v561_v54  ;;  %v563_v60 = vmax.f32 %v531_v55, 0.0  ;;  %v1476_v54 = vld [vmem:[%s1543_s7] sm:$0x3] }
 0x148   :  { %v564_v58 = vmax.f32 %v532_v57, 0.0  ;;  %v454_v59 = vpop.f32.mrb[14].mxu0  ;;  %v871_v55 = vrot.slane %v1476_v54, %v1433_v15 }
 0x149   :  { %v533_v61 = vadd.f32 %v1436_v16, %v454_v59  ;;  %v456_v62 = vpop.f32.mrb[15].mxu0 }
 0x14a   :  { %v534_v63 = vadd.f32 %v1439_v17, %v456_v62  ;;  %759 = vmatprep.mubr.f32.mxu1 %v564_v58 }
 0x14b   :  { %760 = vmatmul.mubr.f32.gmra.mrb[12].mxu1 %v563_v60  ;;  %v565_v3 = vmax.f32 %v533_v61, 0.0 }
 0x14c   :  { %v566_v0 = vmax.f32 %v534_v63, 0.0  ;;  %v460_v2 = vpop.f32.mrb[16].mxu0 }
 0x14d   :  { %v535_v4 = vadd.f32 %v1436_v16, %v460_v2  ;;  %v462_v5 = vpop.f32.mrb[17].mxu0 }
 0x14e   :  { %v536_v6 = vadd.f32 %v1439_v17, %v462_v5  ;;  %765 = vmatprep.mubr.f32.mxu1 %v566_v0 }
 0x14f   :  { %766 = vmatmul.mubr.f32.gmra.mrb[14].mxu1 %v565_v3  ;;  %v567_v9 = vmax.f32 %v535_v4, 0.0 }
 0x150   :  { %v568_v7 = vmax.f32 %v536_v6, 0.0  ;;  %v466_v8 = vpop.f32.mrb[18].mxu0 }
 0x151   :  { %v537_v10 = vadd.f32 %v1436_v16, %v466_v8  ;;  %v468_v11 = vpop.f32.mrb[19].mxu0 }
 0x152   :  { %v538_v12 = vadd.f32 %v1439_v17, %v468_v11  ;;  %771 = vmatprep.mubr.f32.mxu1 %v568_v7 }
 0x153   :  { %772 = vmatmul.mubr.f32.gmra.mrb[16].mxu1 %v567_v9  ;;  %v569_v18 = vmax.f32 %v537_v10, 0.0 }
 0x154   :  { %v570_v1 = vmax.f32 %v538_v12, 0.0  ;;  %v472_v14 = vpop.f32.mrb[20].mxu0 }
 0x155   :  { %v539_v19 = vadd.f32 %v1436_v16, %v472_v14  ;;  %v474_v20 = vpop.f32.mrb[21].mxu0 }
 0x156   :  { %v540_v21 = vadd.f32 %v1439_v17, %v474_v20  ;;  %777 = vmatprep.mubr.f32.mxu1 %v570_v1 }
 0x157   :  { %778 = vmatmul.mubr.f32.gmra.mrb[18].mxu1 %v569_v18  ;;  %v571_v24 = vmax.f32 %v539_v19, 0.0 }
 0x158   :  { %v572_v22 = vmax.f32 %v540_v21, 0.0  ;;  %v478_v23 = vpop.f32.mrb[22].mxu0 }
 0x159   :  { %v541_v25 = vadd.f32 %v1436_v16, %v478_v23  ;;  %v480_v26 = vpop.f32.mrb[23].mxu0 }
 0x15a   :  { %v542_v27 = vadd.f32 %v1439_v17, %v480_v26  ;;  %783 = vmatprep.mubr.f32.mxu1 %v572_v22 }
 0x15b   :  { %784 = vmatmul.mubr.f32.gmra.mrb[20].mxu1 %v571_v24  ;;  %v573_v30 = vmax.f32 %v541_v25, 0.0 }
 0x15c   :  { %v574_v28 = vmax.f32 %v542_v27, 0.0  ;;  %v484_v29 = vpop.f32.mrb[24].mxu0 }
 0x15d   :  { %v543_v31 = vadd.f32 %v1436_v16, %v484_v29  ;;  %v486_v32 = vpop.f32.mrb[25].mxu0 }
 0x15e   :  { %v544_v33 = vadd.f32 %v1439_v17, %v486_v32  ;;  %789 = vmatprep.mubr.f32.mxu1 %v574_v28 }
 0x15f   :  { %790 = vmatmul.mubr.f32.gmra.mrb[22].mxu1 %v573_v30  ;;  %v575_v36 = vmax.f32 %v543_v31, 0.0 }
 0x160   :  { %v576_v34 = vmax.f32 %v544_v33, 0.0  ;;  %v490_v35 = vpop.f32.mrb[26].mxu0 }
 0x161   :  { %v545_v37 = vadd.f32 %v1436_v16, %v490_v35  ;;  %v492_v38 = vpop.f32.mrb[27].mxu0 }
 0x162   :  { %v546_v39 = vadd.f32 %v1439_v17, %v492_v38  ;;  %795 = vmatprep.mubr.f32.mxu1 %v576_v34 }
 0x163   :  { %796 = vmatmul.mubr.f32.gmra.mrb[24].mxu1 %v575_v36  ;;  %v577_v42 = vmax.f32 %v545_v37, 0.0 }
 0x164   :  { %v578_v40 = vmax.f32 %v546_v39, 0.0  ;;  %v496_v41 = vpop.f32.mrb[28].mxu0 }
 0x165   :  { %v547_v43 = vadd.f32 %v1436_v16, %v496_v41  ;;  %v498_v44 = vpop.f32.mrb[29].mxu0 }
 0x166   :  { %v548_v45 = vadd.f32 %v1439_v17, %v498_v44  ;;  %801 = vmatprep.mubr.f32.mxu1 %v578_v40 }
 0x167   :  { %802 = vmatmul.mubr.f32.gmra.mrb[26].mxu1 %v577_v42  ;;  %v579_v48 = vmax.f32 %v547_v43, 0.0 }
 0x168   :  { %v580_v46 = vmax.f32 %v548_v45, 0.0  ;;  %v502_v47 = vpop.f32.mrb[30].mxu0 }
 0x169   :  { %v549_v49 = vadd.f32 %v1436_v16, %v502_v47  ;;  %v504_v50 = vpop.f32.mrb[31].mxu0  ;;  %v1183_v16 = vmov 0  }
 0x16a   :  { %v550_v51 = vadd.f32 %v1439_v17, %v504_v50  ;;  %807 = vmatprep.mubr.f32.mxu1 %v580_v46  ;;  %1130 = vset.pattern.permute.xlu0 %v1183_v16  ;;  %v647_v17 = vld [vmem:[%s1542_s6] sm:$0x3]  ;;  %s1184_s6 = smov [#allocation6]  }
 0x16b   :  { %808 = vmatmul.mubr.f32.gmra.mrb[28].mxu1 %v579_v48  ;;  %v581_v53 = vmax.f32 %v549_v49, 0.0  ;;  %856 = vperm.xlu0 %1130, %v853_v56   ;;  %v1484_v57 = vrot.slane %v647_v17, %v1428_v13  ;;  %v1487_v59 = vrot.slane %v647_v17, %v1433_v15  ;;  %s951_s7 = sshll.u32 %s1184_s6, 4  ;;  %s952_s7 = int_to_ptr.vmem [resolvable:$true] %s951_s7 }
 0x16c   :  { %v582_v52 = vmax.f32 %v550_v51, 0.0  ;;  %s1153_s27 = scalar_lea.vmem %s952_s7, 16  ;;  %s1157_s28 = scalar_lea.vmem %s952_s7, 32 }
 0x16d   :  { %p1154_p8 = scmp.ne.s32.totalorder %s952_s7, %s1153_s27  ;;  %p1158_p9 = scmp.lt.s32.totalorder %s952_s7, %s952_s7 }
 0x16e   :  { %813 = vmatprep.mubr.f32.mxu1 %v582_v52  ;;  %p1159_p10 = scmp.lt.s32.totalorder %s1157_s28, %s1153_s27 }
 0x16f   :  { %814 = vmatmul.mubr.f32.gmra.mrb[30].mxu1 %v581_v53 }
 0x170   :  { %938 = vmatprep.mubr.f32.mxu1 %v871_v55  ;;  %p1160_p11 = por %p1159_p10, %p1158_p9 }
 0x172   :  { %p1161_p12 = pnand %p1160_p11, %p1154_p8 }
 0x206   :  { %v725_v58 = vpop.f32.mrb[0].mxu1 }
 0x207   :  { %v727_v60 = vpop.f32.mrb[1].mxu1  ;;  %v726_v61 = vadd.f32 %v725_v58, %v1484_v57 }
 0x208   :  { %v728_v62 = vadd.f32 %v727_v60, %v1487_v59 }
 0x209   :  { %v820_v4 = vmax.f32 %v726_v61, 0.0 }
 0x20a   :  { %v731_v63 = vpop.f32.mrb[2].mxu1  ;;  %v821_v6 = vmax.f32 %v728_v62, 0.0 }
 0x20b   :  { %v732_v0 = vadd.f32 %v731_v63, %v1484_v57  ;;  %v733_v2 = vpop.f32.mrb[3].mxu1 }
 0x20c   :  { %v734_v3 = vadd.f32 %v733_v2, %v1487_v59 }
 0x20d   :  { %v822_v5 = vmax.f32 %v732_v0, 0.0 }
 0x20e   :  { %v823_v7 = vmax.f32 %v734_v3, 0.0  ;;  %v737_v8 = vpop.f32.mrb[4].mxu1 }
 0x20f   :  { %v1062_v9 = vpack.c.bf16 %v822_v5, %v820_v4  ;;  %v739_v10 = vpop.f32.mrb[5].mxu1  ;;  %v738_v11 = vadd.f32 %v737_v8, %v1484_v57 }
 0x210   :  { %v1060_v15 = vpack.c.bf16 %v823_v7, %v821_v6  ;;  %v740_v12 = vadd.f32 %v739_v10, %v1487_v59 }
 0x211   :  { %v824_v20 = vmax.f32 %v738_v11, 0.0 }
 0x212   :  { %v743_v1 = vpop.f32.mrb[6].mxu1  ;;  %1061 = vmatprep.subr.bf16.mxu1 %v1060_v15  ;;  %v825_v22 = vmax.f32 %v740_v12, 0.0 }
 0x213   :  { %v744_v14 = vadd.f32 %v743_v1, %v1484_v57  ;;  %v745_v18 = vpop.f32.mrb[7].mxu1  ;;  %1063 = vmatpush1.bf16.xpose.msra.mxu1 %v1062_v9 }
 0x214   :  { %v746_v19 = vadd.f32 %v745_v18, %v1487_v59 }
 0x215   :  { %v826_v21 = vmax.f32 %v744_v14, 0.0 }
 0x216   :  { %v827_v23 = vmax.f32 %v746_v19, 0.0  ;;  %v749_v24 = vpop.f32.mrb[8].mxu1 }
 0x217   :  { %v1066_v25 = vpack.c.bf16 %v826_v21, %v824_v20  ;;  %v751_v26 = vpop.f32.mrb[9].mxu1  ;;  %v750_v28 = vadd.f32 %v749_v24, %v1484_v57 }
 0x218   :  { %v1064_v27 = vpack.c.bf16 %v827_v23, %v825_v22  ;;  %v752_v29 = vadd.f32 %v751_v26, %v1487_v59 }
 0x219   :  { %v828_v34 = vmax.f32 %v750_v28, 0.0 }
 0x21a   :  { %v755_v30 = vpop.f32.mrb[10].mxu1  ;;  %1065 = vmatprep.subr.bf16.mxu1 %v1064_v27  ;;  %v829_v36 = vmax.f32 %v752_v29, 0.0 }
 0x21b   :  { %v756_v31 = vadd.f32 %v755_v30, %v1484_v57  ;;  %v757_v32 = vpop.f32.mrb[11].mxu1  ;;  %1067 = vmatpush1.bf16.xpose.msra.mxu1 %v1066_v25 }
 0x21c   :  { %v758_v33 = vadd.f32 %v757_v32, %v1487_v59 }
 0x21d   :  { %v830_v35 = vmax.f32 %v756_v31, 0.0 }
 0x21e   :  { %v831_v37 = vmax.f32 %v758_v33, 0.0  ;;  %v761_v38 = vpop.f32.mrb[12].mxu1 }
 0x21f   :  { %v1070_v39 = vpack.c.bf16 %v830_v35, %v828_v34  ;;  %v763_v40 = vpop.f32.mrb[13].mxu1  ;;  %v762_v42 = vadd.f32 %v761_v38, %v1484_v57 }
 0x220   :  { %v1068_v41 = vpack.c.bf16 %v831_v37, %v829_v36  ;;  %v764_v43 = vadd.f32 %v763_v40, %v1487_v59 }
 0x221   :  { %v832_v48 = vmax.f32 %v762_v42, 0.0 }
 0x222   :  { %v767_v44 = vpop.f32.mrb[14].mxu1  ;;  %1069 = vmatprep.subr.bf16.mxu1 %v1068_v41  ;;  %v833_v50 = vmax.f32 %v764_v43, 0.0 }
 0x223   :  { %v768_v45 = vadd.f32 %v767_v44, %v1484_v57  ;;  %v769_v46 = vpop.f32.mrb[15].mxu1  ;;  %1071 = vmatpush1.bf16.xpose.msra.mxu1 %v1070_v39 }
 0x224   :  { %v770_v47 = vadd.f32 %v769_v46, %v1487_v59 }
 0x225   :  { %v834_v49 = vmax.f32 %v768_v45, 0.0 }
 0x226   :  { %v835_v51 = vmax.f32 %v770_v47, 0.0  ;;  %v773_v52 = vpop.f32.mrb[16].mxu1 }
 0x227   :  { %v1074_v53 = vpack.c.bf16 %v834_v49, %v832_v48  ;;  %v775_v55 = vpop.f32.mrb[17].mxu1  ;;  %v774_v16 = vadd.f32 %v773_v52, %v1484_v57 }
 0x228   :  { %v1072_v56 = vpack.c.bf16 %v835_v51, %v833_v50  ;;  %v776_v17 = vadd.f32 %v775_v55, %v1487_v59  ;;  %v867_v50 = vrot.slane %v1476_v54, %v1428_v13  ;;  %v857_v51 = vpop.permute.xlu0 %856 }
 0x229   :  { %v836_v63 = vmax.f32 %v774_v16, 0.0  ;;  %v862_v52 = vrot.slane %v857_v51, %v1428_v13 }
 0x22a   :  { %v779_v58 = vpop.f32.mrb[18].mxu1  ;;  %1073 = vmatprep.subr.bf16.mxu1 %v1072_v56  ;;  %v837_v2 = vmax.f32 %v776_v17, 0.0 }
 0x22b   :  { %v780_v60 = vadd.f32 %v779_v58, %v1484_v57  ;;  %v781_v61 = vpop.f32.mrb[19].mxu1  ;;  %1075 = vmatpush1.bf16.xpose.msra.mxu1 %v1074_v53 }
 0x22c   :  { %v782_v62 = vadd.f32 %v781_v61, %v1487_v59 }
 0x22d   :  { %v838_v0 = vmax.f32 %v780_v60, 0.0 }
 0x22e   :  { %v839_v3 = vmax.f32 %v782_v62, 0.0  ;;  %v785_v4 = vpop.f32.mrb[20].mxu1 }
 0x22f   :  { %v1078_v5 = vpack.c.bf16 %v838_v0, %v836_v63  ;;  %v787_v6 = vpop.f32.mrb[21].mxu1  ;;  %v786_v8 = vadd.f32 %v785_v4, %v1484_v57 }
 0x230   :  { %v1076_v7 = vpack.c.bf16 %v839_v3, %v837_v2  ;;  %v788_v9 = vadd.f32 %v787_v6, %v1487_v59 }
 0x231   :  { %v840_v1 = vmax.f32 %v786_v8, 0.0 }
 0x232   :  { %v791_v10 = vpop.f32.mrb[22].mxu1  ;;  %1077 = vmatprep.subr.bf16.mxu1 %v1076_v7  ;;  %v841_v18 = vmax.f32 %v788_v9, 0.0 }
 0x233   :  { %v792_v15 = vadd.f32 %v791_v10, %v1484_v57  ;;  %v793_v11 = vpop.f32.mrb[23].mxu1  ;;  %1079 = vmatpush1.bf16.xpose.msra.mxu1 %v1078_v5 }
 0x234   :  { %v794_v12 = vadd.f32 %v793_v11, %v1487_v59 }
 0x235   :  { %v842_v14 = vmax.f32 %v792_v15, 0.0 }
 0x236   :  { %v843_v19 = vmax.f32 %v794_v12, 0.0  ;;  %v797_v20 = vpop.f32.mrb[24].mxu1 }
 0x237   :  { %v1082_v21 = vpack.c.bf16 %v842_v14, %v840_v1  ;;  %v799_v22 = vpop.f32.mrb[25].mxu1  ;;  %v798_v24 = vadd.f32 %v797_v20, %v1484_v57 }
 0x238   :  { %v1080_v23 = vpack.c.bf16 %v843_v19, %v841_v18  ;;  %v800_v25 = vadd.f32 %v799_v22, %v1487_v59 }
 0x239   :  { %v844_v30 = vmax.f32 %v798_v24, 0.0 }
 0x23a   :  { %v803_v26 = vpop.f32.mrb[26].mxu1  ;;  %1081 = vmatprep.subr.bf16.mxu1 %v1080_v23  ;;  %v845_v32 = vmax.f32 %v800_v25, 0.0 }
 0x23b   :  { %v804_v27 = vadd.f32 %v803_v26, %v1484_v57  ;;  %v805_v28 = vpop.f32.mrb[27].mxu1  ;;  %1083 = vmatpush1.bf16.xpose.msra.mxu1 %v1082_v21 }
 0x23c   :  { %v806_v29 = vadd.f32 %v805_v28, %v1487_v59 }
 0x23d   :  { %v846_v31 = vmax.f32 %v804_v27, 0.0 }
 0x23e   :  { %v847_v33 = vmax.f32 %v806_v29, 0.0  ;;  %v809_v34 = vpop.f32.mrb[28].mxu1 }
 0x23f   :  { %v1086_v35 = vpack.c.bf16 %v846_v31, %v844_v30  ;;  %v811_v36 = vpop.f32.mrb[29].mxu1  ;;  %v810_v38 = vadd.f32 %v809_v34, %v1484_v57 }
 0x240   :  { %v1084_v37 = vpack.c.bf16 %v847_v33, %v845_v32  ;;  %v812_v39 = vadd.f32 %v811_v36, %v1487_v59 }
 0x241   :  { %v848_v44 = vmax.f32 %v810_v38, 0.0 }
 0x242   :  { %v815_v40 = vpop.f32.mrb[30].mxu1  ;;  %1085 = vmatprep.subr.bf16.mxu1 %v1084_v37  ;;  %v849_v46 = vmax.f32 %v812_v39, 0.0 }
 0x243   :  { %v816_v41 = vadd.f32 %v815_v40, %v1484_v57  ;;  %v817_v42 = vpop.f32.mrb[31].mxu1  ;;  %1087 = vmatpush1.bf16.xpose.msra.mxu1 %v1086_v35 }
 0x244   :  { %v818_v43 = vadd.f32 %v817_v42, %v1487_v59 }
 0x245   :  { %v850_v45 = vmax.f32 %v816_v41, 0.0 }
 0x246   :  { %v851_v47 = vmax.f32 %v818_v43, 0.0 }
 0x247   :  { %v1090_v48 = vpack.c.bf16 %v850_v45, %v848_v44 }
 0x248   :  { %v1088_v49 = vpack.c.bf16 %v851_v47, %v849_v46 }
 0x24a   :  { %1089 = vmatprep.subr.bf16.mxu1 %v1088_v49 }
 0x24b   :  { %1091 = vmatpush1.bf16.xpose.msra.mxu1 %v1090_v48 }
 0x252   :  { %939 = vmatmul.mubr.f32.vlgmr.msra.gmra.mrb[32].mxu1 %v867_v50 }
 0x325   :  { %v940_v57 = vpop.f32.mrb[32].mxu1 }
 0x326   :  { %v941_v53 = vadd.f32 %v940_v57, %v862_v52  ;;  %v942_v59 = vpop.f32.mrb[33].mxu1 }
 0x328   :  { %944 = vst [vmem:[#allocation6] sm:$0x1] %v941_v53 }
 0x329   :  { %1164 = shalt.err (!%p1161_p12)
}
 0x32a   :  { %s1165_s30 = scalar_lea.hbm %s1545_s9, 16 }
 0x32b   :  { %p1166_p13 = scmp.ne.s32.totalorder %s1545_s9, %s1165_s30  ;;  %p1169_p0 = scmp.lt.u32.totalorder %s1165_s30, %s1545_s9 }
 0x32d   :  { %p1171_p1 = pnand %p1169_p0, %p1166_p13 }
 0x32f   :  { %1174 = shalt.err (!%p1171_p1)
}
 0x330   :  { %954 = dma.vmem_to_hbm [thread:$0]  %s952_s7, 16, %s1545_s9, [#allocation5]  }
 0x331   :  { %1177 = dma.done.wait [#allocation5], 16  }
 0x332   :  { %1178 = vsyncadd [#allocation5], 4294967280 }
 0x333   :  { %958 = vsyncpa [#allocation4], 1 }
 0x334   :  { %959 = vsyncpa [#allocation5], 1 }

</bundles_post_ra>
